<compile_context>
chip_gen: v7x
topology: tpu7x:2x2x1
jax: 0.10.0
libtpu: 0.0.40
codegen_flags: <defaults>
</compile_context>

<pallas_src>
import functools

import jax
import jax.numpy as jnp
from jax.experimental import pallas as pl
from jax.experimental.pallas import tpu as pltpu

_SUBLANE = 8     # f32 sublane count per vreg
_LANE = 128      # lane count per vreg (head output padded to this)


# ----------------------------------------------------------------------------
# Fused forward kernel: everything stays in VMEM / vregs.
# ----------------------------------------------------------------------------
def _fused_forward_kernel(
    x_tab_ref, x_seq_ref,
    w_tab_ref, b_tab_ref,
    w_seq_ref, b_seq_ref,
    w_fus_ref, b_fus_ref,
    w_heads_ref, b_heads_ref,
    o_ref, *, hidden,
):
    # input_modules: Linear + ReLU per input
    f_tab = jnp.dot(x_tab_ref[...], w_tab_ref[...],
                    preferred_element_type=jnp.float32)
    f_tab = jnp.maximum(f_tab + b_tab_ref[...], 0.0)

    f_seq = jnp.dot(x_seq_ref[...], w_seq_ref[...],
                    preferred_element_type=jnp.float32)
    f_seq = jnp.maximum(f_seq + b_seq_ref[...], 0.0)

    # fusion_modules["computed"]: concat([f_tab, f_seq]) @ w_fus + b, ReLU.
    # The concat is avoided via static (zero-cost) slices of the fusion weight.
    acc = jnp.dot(f_tab, w_fus_ref[:hidden, :],
                  preferred_element_type=jnp.float32)
    acc += jnp.dot(f_seq, w_fus_ref[hidden:, :],
                   preferred_element_type=jnp.float32)
    fused = jnp.maximum(acc + b_fus_ref[...], 0.0)

    # output_modules: both heads merged into one lane-dense (N=128 padded) matmul.
    heads = jnp.dot(fused, w_heads_ref[...],
                    preferred_element_type=jnp.float32)
    o_ref[...] = (heads + b_heads_ref[...]).astype(o_ref.dtype)


def fused_forward(x_tab, x_seq_flat, params, *, hidden):
    """Run the whole ModuleStorage forward in one pallas_call.

    Returns the padded (M_pad, 128) head slab; caller slices rows/columns.
    """
    B, K_tab = x_tab.shape
    K_seq = x_seq_flat.shape[1]
    N_heads = params["w_heads"].shape[1]

    # Pad batch rows up to a sublane multiple for better vreg occupancy.
    M = max(_SUBLANE, ((B + _SUBLANE - 1) // _SUBLANE) * _SUBLANE)
    if M != B:
        pad = M - B
        x_tab = jnp.pad(x_tab, ((0, pad), (0, 0)))
        x_seq_flat = jnp.pad(x_seq_flat, ((0, pad), (0, 0)))

    def full(shape):
        return pl.BlockSpec(shape, lambda i, _n=len(shape): (0,) * _n)

    out = pl.pallas_call(
        functools.partial(_fused_forward_kernel, hidden=hidden),
        out_shape=jax.ShapeDtypeStruct((M, N_heads), jnp.float32),
        grid=(1,),
        in_specs=[
            full((M, K_tab)),
            full((M, K_seq)),
            full((K_tab, hidden)), full((1, hidden)),
            full((K_seq, hidden)), full((1, hidden)),
            full((2 * hidden, hidden)), full((1, hidden)),
            full((hidden, N_heads)), full((1, N_heads)),
        ],
        out_specs=full((M, N_heads)),
        compiler_params=pltpu.CompilerParams(
            dimension_semantics=("arbitrary",),
        ),
    )(
        x_tab, x_seq_flat,
        params["w_tab"], params["b_tab"],
        params["w_seq"], params["b_seq"],
        params["w_fus"], params["b_fus"],
        params["w_heads"], params["b_heads"],
    )
    return out


# ----------------------------------------------------------------------------
# ModuleStorage equivalent
# ----------------------------------------------------------------------------
def _init_linear(key, fan_in, fan_out):
    kw, kb = jax.random.split(key)
    lim = 1.0 / jnp.sqrt(fan_in)
    w = jax.random.uniform(kw, (fan_in, fan_out), jnp.float32, -lim, lim)
    b = jax.random.uniform(kb, (fan_out,), jnp.float32, -lim, lim)
    return w, b


class ModuleStoragePallas:
    """JAX/Pallas equivalent of eir ModuleStorage with concrete submodules."""

    def __init__(self, key, *, tab_dim=16, seq_len=8, seq_hidden=32, hidden=32):
        keys = jax.random.split(key, 6)
        self.hidden = hidden
        self.n_anc = 4   # "ancestry"/"origin" head width (classification)
        self.n_hgt = 1   # "height"/"height" head width (regression)

        # input_modules
        self.w_tab, b_tab = _init_linear(keys[0], tab_dim, hidden)
        self.w_seq, b_seq = _init_linear(keys[1], seq_len * seq_hidden, hidden)
        # fusion_modules["computed"]: Linear(2*hidden -> hidden)
        self.w_fus, b_fus = _init_linear(keys[2], 2 * hidden, hidden)
        # output_modules (multi-task heads) -- kept unpadded for the reference
        self.w_anc, self.b_anc = _init_linear(keys[3], hidden, self.n_anc)
        self.w_hgt, self.b_hgt = _init_linear(keys[4], hidden, self.n_hgt)

        # Kernel-side parameter bundle (built once at init, not per call):
        #  - biases as (1, N) rows
        #  - both heads stacked + zero-padded to a lane-dense 128-wide weight
        n_pad = _LANE
        w_heads = jnp.zeros((hidden, n_pad), jnp.float32)
        w_heads = w_heads.at[:, : self.n_anc].set(self.w_anc)
        w_heads = w_heads.at[:, self.n_anc : self.n_anc + self.n_hgt].set(self.w_hgt)
        b_heads = jnp.zeros((1, n_pad), jnp.float32)
        b_heads = b_heads.at[0, : self.n_anc].set(self.b_anc)
        b_heads = b_heads.at[0, self.n_anc : self.n_anc + self.n_hgt].set(self.b_hgt)

        self.params = {
            "w_tab": self.w_tab, "b_tab": b_tab.reshape(1, hidden),
            "w_seq": self.w_seq, "b_seq": b_seq.reshape(1, hidden),
            "w_fus": self.w_fus, "b_fus": b_fus.reshape(1, hidden),
            "w_heads": w_heads, "b_heads": b_heads,
        }
        self.b_tab = b_tab
        self.b_seq = b_seq
        self.b_fus = b_fus

    def __call__(self, inputs):
        x_tab = inputs["tabular"]
        seq = inputs["sequence"]
        B = x_tab.shape[0]
        seq_flat = seq.reshape(B, -1)  # glue: flatten (B,S,H)->(B,S*H)

        # Entire run_meta_forward (input modules -> fusion -> output heads)
        # in one fused Pallas kernel; intermediates never leave VMEM.
        heads = fused_forward(x_tab, seq_flat, self.params, hidden=self.hidden)

        # Glue: drop batch-pad rows and split the lane-padded head slab.
        origin = heads[:B, : self.n_anc]
        height = heads[:B, self.n_anc : self.n_anc + self.n_hgt]
        return {
            "ancestry": {"origin": origin},
            "height": {"height": height},
        }


# ----------------------------------------------------------------------------
# Reference (pure jnp) for correctness check
# ----------------------------------------------------------------------------
def reference_forward(m: ModuleStoragePallas, inputs):
    relu = lambda x: jnp.maximum(x, 0.0)
    f_tab = relu(inputs["tabular"] @ m.w_tab + m.b_tab)
    f_seq = relu(inputs["sequence"].reshape(inputs["sequence"].shape[0], -1)
                 @ m.w_seq + m.b_seq)
    fused = relu(jnp.concatenate([f_tab, f_seq], axis=-1) @ m.w_fus + m.b_fus)
    return {
        "ancestry": {"origin": fused @ m.w_anc + m.b_anc},
        "height": {"height": fused @ m.w_hgt + m.b_hgt},
    }


if __name__ == "__main__":
    key = jax.random.PRNGKey(0)
    k_model, k_tab, k_seq = jax.random.split(key, 3)

    B, TAB, S, H = 2, 16, 8, 32
    inputs = {
        "tabular": jax.random.normal(k_tab, (B, TAB), jnp.float32),
        "sequence": jax.random.normal(k_seq, (B, S, H), jnp.float32),
    }

    model = ModuleStoragePallas(k_model, tab_dim=TAB, seq_len=S, seq_hidden=H,
                                hidden=32)

    out = model(inputs)
    out = jax.block_until_ready(out)

    ref = reference_forward(model, inputs)
    for oname in out:
        for tname in out[oname]:
            got, want = out[oname][tname], ref[oname][tname]
            assert got.shape == want.shape, (oname, tname, got.shape, want.shape)
            assert jnp.allclose(got, want, atol=1e-4, rtol=1e-4), (oname, tname)

    print("KERNEL_OK")
</pallas_src>

<mosaic_0001>
module attributes {stable_mosaic.version = 11 : i64} {
  func.func @_fused_forward_kernel(%arg0: i32, %arg1: memref<8x16xf32, #tpu.memory_space<vmem>>, %arg2: memref<8x256xf32, #tpu.memory_space<vmem>>, %arg3: memref<16x32xf32, #tpu.memory_space<vmem>>, %arg4: memref<1x32xf32, #tpu.memory_space<vmem>>, %arg5: memref<256x32xf32, #tpu.memory_space<vmem>>, %arg6: memref<1x32xf32, #tpu.memory_space<vmem>>, %arg7: memref<64x32xf32, #tpu.memory_space<vmem>>, %arg8: memref<1x32xf32, #tpu.memory_space<vmem>>, %arg9: memref<32x128xf32, #tpu.memory_space<vmem>>, %arg10: memref<1x128xf32, #tpu.memory_space<vmem>>, %arg11: memref<8x128xf32, #tpu.memory_space<vmem>>) attributes {dimension_semantics = [#tpu.dimension_semantics<arbitrary>], iteration_bounds = array<i64: 1>, scalar_prefetch = 0 : i64, scratch_operands = 0 : i64, tpu.core_type = #tpu.core_type<tc>, window_params = [{pipeline_mode = #tpu.pipeline_mode<synchronous>, transform_indices = @transform_0, window_bounds = array<i64: 8, 16>}, {pipeline_mode = #tpu.pipeline_mode<synchronous>, transform_indices = @transform_1, window_bounds = array<i64: 8, 256>}, {pipeline_mode = #tpu.pipeline_mode<synchronous>, transform_indices = @transform_2, window_bounds = array<i64: 16, 32>}, {pipeline_mode = #tpu.pipeline_mode<synchronous>, transform_indices = @transform_3, window_bounds = array<i64: 1, 32>}, {pipeline_mode = #tpu.pipeline_mode<synchronous>, transform_indices = @transform_4, window_bounds = array<i64: 256, 32>}, {pipeline_mode = #tpu.pipeline_mode<synchronous>, transform_indices = @transform_5, window_bounds = array<i64: 1, 32>}, {pipeline_mode = #tpu.pipeline_mode<synchronous>, transform_indices = @transform_6, window_bounds = array<i64: 64, 32>}, {pipeline_mode = #tpu.pipeline_mode<synchronous>, transform_indices = @transform_7, window_bounds = array<i64: 1, 32>}, {pipeline_mode = #tpu.pipeline_mode<synchronous>, transform_indices = @transform_8, window_bounds = array<i64: 32, 128>}, {pipeline_mode = #tpu.pipeline_mode<synchronous>, transform_indices = @transform_9, window_bounds = array<i64: 1, 128>}, {pipeline_mode = #tpu.pipeline_mode<synchronous>, transform_indices = @transform_10, window_bounds = array<i64: 8, 128>}]} {
    %c0 = arith.constant 0 : index
    %c0_0 = arith.constant 0 : index
    %0 = vector.load %arg1[%c0, %c0_0] : memref<8x16xf32, #tpu.memory_space<vmem>>, vector<8x16xf32>
    %c0_1 = arith.constant 0 : index
    %c0_2 = arith.constant 0 : index
    %1 = vector.load %arg3[%c0_1, %c0_2] : memref<16x32xf32, #tpu.memory_space<vmem>>, vector<16x32xf32>
    %cst = arith.constant dense<0.000000e+00> : vector<8x32xf32>
    %2 = tpu.matmul %0, %1, %cst {dimension_numbers = #tpu.dot_dimension_numbers<[1], [0], [0], [1], [0, 0, 1, 1], [], []>} : vector<8x16xf32>, vector<16x32xf32>, vector<8x32xf32> -> vector<8x32xf32>
    %c0_3 = arith.constant 0 : index
    %c0_4 = arith.constant 0 : index
    %3 = vector.load %arg4[%c0_3, %c0_4] : memref<1x32xf32, #tpu.memory_space<vmem>>, vector<1x32xf32>
    %4 = vector.broadcast %3 : vector<1x32xf32> to vector<8x32xf32>
    %5 = arith.addf %2, %4 : vector<8x32xf32>
    %cst_5 = arith.constant 0.000000e+00 : f32
    %6 = vector.broadcast %cst_5 : f32 to vector<8x32xf32>
    %7 = arith.maximumf %5, %6 : vector<8x32xf32>
    %c0_6 = arith.constant 0 : index
    %c0_7 = arith.constant 0 : index
    %8 = vector.load %arg2[%c0_6, %c0_7] : memref<8x256xf32, #tpu.memory_space<vmem>>, vector<8x256xf32>
    %c0_8 = arith.constant 0 : index
    %c0_9 = arith.constant 0 : index
    %9 = vector.load %arg5[%c0_8, %c0_9] : memref<256x32xf32, #tpu.memory_space<vmem>>, vector<256x32xf32>
    %cst_10 = arith.constant dense<0.000000e+00> : vector<8x32xf32>
    %10 = tpu.matmul %8, %9, %cst_10 {dimension_numbers = #tpu.dot_dimension_numbers<[1], [0], [0], [1], [0, 0, 1, 1], [], []>} : vector<8x256xf32>, vector<256x32xf32>, vector<8x32xf32> -> vector<8x32xf32>
    %c0_11 = arith.constant 0 : index
    %c0_12 = arith.constant 0 : index
    %11 = vector.load %arg6[%c0_11, %c0_12] : memref<1x32xf32, #tpu.memory_space<vmem>>, vector<1x32xf32>
    %12 = vector.broadcast %11 : vector<1x32xf32> to vector<8x32xf32>
    %13 = arith.addf %10, %12 : vector<8x32xf32>
    %cst_13 = arith.constant 0.000000e+00 : f32
    %14 = vector.broadcast %cst_13 : f32 to vector<8x32xf32>
    %15 = arith.maximumf %13, %14 : vector<8x32xf32>
    %c0_14 = arith.constant 0 : index
    %c0_15 = arith.constant 0 : index
    %16 = vector.load %arg7[%c0_14, %c0_15] : memref<64x32xf32, #tpu.memory_space<vmem>>, vector<32x32xf32>
    %cst_16 = arith.constant dense<0.000000e+00> : vector<8x32xf32>
    %17 = tpu.matmul %7, %16, %cst_16 {dimension_numbers = #tpu.dot_dimension_numbers<[1], [0], [0], [1], [0, 0, 1, 1], [], []>} : vector<8x32xf32>, vector<32x32xf32>, vector<8x32xf32> -> vector<8x32xf32>
    %c32 = arith.constant 32 : index
    %c0_17 = arith.constant 0 : index
    %18 = vector.load %arg7[%c32, %c0_17] : memref<64x32xf32, #tpu.memory_space<vmem>>, vector<32x32xf32>
    %cst_18 = arith.constant dense<0.000000e+00> : vector<8x32xf32>
    %19 = tpu.matmul %15, %18, %cst_18 {dimension_numbers = #tpu.dot_dimension_numbers<[1], [0], [0], [1], [0, 0, 1, 1], [], []>} : vector<8x32xf32>, vector<32x32xf32>, vector<8x32xf32> -> vector<8x32xf32>
    %20 = arith.addf %17, %19 : vector<8x32xf32>
    %c0_19 = arith.constant 0 : index
    %c0_20 = arith.constant 0 : index
    %21 = vector.load %arg8[%c0_19, %c0_20] : memref<1x32xf32, #tpu.memory_space<vmem>>, vector<1x32xf32>
    %22 = vector.broadcast %21 : vector<1x32xf32> to vector<8x32xf32>
    %23 = arith.addf %20, %22 : vector<8x32xf32>
    %cst_21 = arith.constant 0.000000e+00 : f32
    %24 = vector.broadcast %cst_21 : f32 to vector<8x32xf32>
    %25 = arith.maximumf %23, %24 : vector<8x32xf32>
    %c0_22 = arith.constant 0 : index
    %c0_23 = arith.constant 0 : index
    %26 = vector.load %arg9[%c0_22, %c0_23] : memref<32x128xf32, #tpu.memory_space<vmem>>, vector<32x128xf32>
    %cst_24 = arith.constant dense<0.000000e+00> : vector<8x128xf32>
    %27 = tpu.matmul %25, %26, %cst_24 {dimension_numbers = #tpu.dot_dimension_numbers<[1], [0], [0], [1], [0, 0, 1, 1], [], []>} : vector<8x32xf32>, vector<32x128xf32>, vector<8x128xf32> -> vector<8x128xf32>
    %c0_25 = arith.constant 0 : index
    %c0_26 = arith.constant 0 : index
    %28 = vector.load %arg10[%c0_25, %c0_26] : memref<1x128xf32, #tpu.memory_space<vmem>>, vector<1x128xf32>
    %29 = vector.broadcast %28 : vector<1x128xf32> to vector<8x128xf32>
    %30 = arith.addf %27, %29 : vector<8x128xf32>
    %c0_27 = arith.constant 0 : index
    %c0_28 = arith.constant 0 : index
    %31 = vector.load %arg11[%c0_27, %c0_28] : memref<8x128xf32, #tpu.memory_space<vmem>>, vector<8x128xf32>
    tpu.vector_store %arg11[%c0_27, %c0_28], %30 {strides = array<i32>} : memref<8x128xf32, #tpu.memory_space<vmem>>, vector<8x128xf32>,
    return
  }
  func.func @transform_0(%arg0: i32) -> (i32, i32) {
    %c0_i32 = arith.constant 0 : i32
    %c0_i32_0 = arith.constant 0 : i32
    %c0_i32_1 = arith.constant 0 : i32
    return %c0_i32, %c0_i32_0 : i32, i32
  }
  func.func @transform_1(%arg0: i32) -> (i32, i32) {
    %c0_i32 = arith.constant 0 : i32
    %c0_i32_0 = arith.constant 0 : i32
    %c0_i32_1 = arith.constant 0 : i32
    return %c0_i32, %c0_i32_0 : i32, i32
  }
  func.func @transform_2(%arg0: i32) -> (i32, i32) {
    %c0_i32 = arith.constant 0 : i32
    %c0_i32_0 = arith.constant 0 : i32
    %c0_i32_1 = arith.constant 0 : i32
    return %c0_i32, %c0_i32_0 : i32, i32
  }
  func.func @transform_3(%arg0: i32) -> (i32, i32) {
    %c0_i32 = arith.constant 0 : i32
    %c0_i32_0 = arith.constant 0 : i32
    %c0_i32_1 = arith.constant 0 : i32
    return %c0_i32, %c0_i32_0 : i32, i32
  }
  func.func @transform_4(%arg0: i32) -> (i32, i32) {
    %c0_i32 = arith.constant 0 : i32
    %c0_i32_0 = arith.constant 0 : i32
    %c0_i32_1 = arith.constant 0 : i32
    return %c0_i32, %c0_i32_0 : i32, i32
  }
  func.func @transform_5(%arg0: i32) -> (i32, i32) {
    %c0_i32 = arith.constant 0 : i32
    %c0_i32_0 = arith.constant 0 : i32
    %c0_i32_1 = arith.constant 0 : i32
    return %c0_i32, %c0_i32_0 : i32, i32
  }
  func.func @transform_6(%arg0: i32) -> (i32, i32) {
    %c0_i32 = arith.constant 0 : i32
    %c0_i32_0 = arith.constant 0 : i32
    %c0_i32_1 = arith.constant 0 : i32
    return %c0_i32, %c0_i32_0 : i32, i32
  }
  func.func @transform_7(%arg0: i32) -> (i32, i32) {
    %c0_i32 = arith.constant 0 : i32
    %c0_i32_0 = arith.constant 0 : i32
    %c0_i32_1 = arith.constant 0 : i32
    return %c0_i32, %c0_i32_0 : i32, i32
  }
  func.func @transform_8(%arg0: i32) -> (i32, i32) {
    %c0_i32 = arith.constant 0 : i32
    %c0_i32_0 = arith.constant 0 : i32
    %c0_i32_1 = arith.constant 0 : i32
    return %c0_i32, %c0_i32_0 : i32, i32
  }
  func.func @transform_9(%arg0: i32) -> (i32, i32) {
    %c0_i32 = arith.constant 0 : i32
    %c0_i32_0 = arith.constant 0 : i32
    %c0_i32_1 = arith.constant 0 : i32
    return %c0_i32, %c0_i32_0 : i32, i32
  }
  func.func @transform_10(%arg0: i32) -> (i32, i32) {
    %c0_i32 = arith.constant 0 : i32
    %c0_i32_0 = arith.constant 0 : i32
    %c0_i32_1 = arith.constant 0 : i32
    return %c0_i32, %c0_i32_0 : i32, i32
  }
}

</mosaic_0001>

<bundles_post_ra>
// kernel: tpu_custom_call.1
= control target key start
LH: loop header
LB: loop body
LE: loop exit
PB: predicated region body
PF: predicated region fallthrough
CT: control target
= control target key end

     0   :  { %v678_v7 = vmov 0.0|0.0   ;;  %vm679_vm0 = vmmov 0   ;;  %v680_v8 = vmov 0.0   ;;  %s926_s0 = inlined_call_operand.vmem [shape: f32[8,16], index: 0, kind: input, shape index: {}]   ;;  %s927_s1 = inlined_call_operand.vmem [shape: f32[8,256], index: 1, kind: input, shape index: {}]   ;;  %s928_s2 = inlined_call_operand.vmem [shape: f32[16,32], index: 2, kind: input, shape index: {}]   ;;  %s929_s3 = inlined_call_operand.vmem [shape: f32[1,32], index: 3, kind: input, shape index: {}]   ;;  %s930_s4 = inlined_call_operand.vmem [shape: f32[256,32], index: 4, kind: input, shape index: {}]   ;;  %s931_s5 = inlined_call_operand.vmem [shape: f32[1,32], index: 5, kind: input, shape index: {}]   ;;  %s932_s6 = inlined_call_operand.vmem [shape: f32[64,32], index: 6, kind: input, shape index: {}]   ;;  %s933_s7 = inlined_call_operand.vmem [shape: f32[1,32], index: 7, kind: input, shape index: {}]   ;;  %s934_s8 = inlined_call_operand.vmem [shape: f32[32,128], index: 8, kind: input, shape index: {}]   ;;  %s935_s9 = inlined_call_operand.vmem [shape: f32[1,128], index: 9, kind: input, shape index: {}]   ;;  %s936_s10 = inlined_call_operand.hbm [shape: f32[8,128], index: 10, kind: output, shape index: {}]  }
   0x1   :  { %v139_v0 = vld [vmem:[%s930_s4 + $0x80] sm:$0xff]  ;;  %v140_v1 = vld [vmem:[%s930_s4 + $0x88] sm:$0xff]  ;;  %v141_v5 = vld [vmem:[%s930_s4 + $0x90] sm:$0xff]  ;;  %597 = vmatprep.subr.bf16.mxu0 %v678_v7  ;;  %561 = vmatprep.mubr.msk.f32.mxu0 %vm679_vm0, %v680_v8 }
   0x2   :  { %v123_v2 = vld [vmem:[%s930_s4] sm:$0xff]  ;;  %v600_v3 = vpack.c.bf16 %v140_v1, %v139_v0  ;;  %v124_v4 = vld [vmem:[%s930_s4 + $0x8] sm:$0xff]  ;;  %v142_v6 = vld [vmem:[%s930_s4 + $0x98] sm:$0xff] }
   0x3   :  { %v602_v9 = vpack.c.bf16 %v124_v4, %v123_v2  ;;  %v604_v10 = vpack.c.bf16 %v142_v6, %v141_v5  ;;  %v125_v11 = vld [vmem:[%s930_s4 + $0x10] sm:$0xff]  ;;  %v126_v12 = vld [vmem:[%s930_s4 + $0x18] sm:$0xff]  ;;  %v143_v13 = vld [vmem:[%s930_s4 + $0xa0] sm:$0xff] }
   0x4   :  { %601 = vmatprep.subr.bf16.mxu1 %v600_v3  ;;  %v144_v14 = vld [vmem:[%s930_s4 + $0xa8] sm:$0xff]  ;;  %v606_v15 = vpack.c.bf16 %v126_v12, %v125_v11  ;;  %v127_v17 = vld [vmem:[%s930_s4 + $0x20] sm:$0xff]  ;;  %v145_v19 = vld [vmem:[%s930_s4 + $0xb0] sm:$0xff] }
   0x5   :  { %603 = vmatpush3.bf16.msra.mxu1 %v602_v9  ;;  %v608_v16 = vpack.c.bf16 %v144_v14, %v143_v13  ;;  %v128_v18 = vld [vmem:[%s930_s4 + $0x28] sm:$0xff]  ;;  %v146_v20 = vld [vmem:[%s930_s4 + $0xb8] sm:$0xff]  ;;  %v129_v23 = vld [vmem:[%s930_s4 + $0x30] sm:$0xff] }
   0x6   :  { %605 = vmatprep.subr.bf16.mxu1 %v604_v10  ;;  %v610_v21 = vpack.c.bf16 %v128_v18, %v127_v17  ;;  %v612_v22 = vpack.c.bf16 %v146_v20, %v145_v19  ;;  %v130_v24 = vld [vmem:[%s930_s4 + $0x38] sm:$0xff]  ;;  %v147_v25 = vld [vmem:[%s930_s4 + $0xc0] sm:$0xff]  ;;  %v148_v26 = vld [vmem:[%s930_s4 + $0xc8] sm:$0xff] }
   0x7   :  { %v122_v27 = vld [vmem:[%s927_s1 + $0x8] sm:$0xff]  ;;  %v37_v28 = vld [vmem:[%s928_s2] sm:$0xff]  ;;  %v614_v30 = vpack.c.bf16 %v130_v24, %v129_v23 }
   0x8   :  { %226 = vmatprep.mubr.f32.mxu1 %v122_v27  ;;  %v38_v29 = vld [vmem:[%s928_s2 + $0x8] sm:$0xff] }
   0x9   :  { %607 = vmatpush3.bf16.msra.mxu1 %v606_v15  ;;  %v598_v31 = vpack.c.bf16 %v38_v29, %v37_v28 }
   0xa   :  { %609 = vmatprep.subr.bf16.mxu1 %v608_v16 }
   0xd   :  { %611 = vmatpush3.bf16.msra.mxu1 %v610_v21 }
   0xe   :  { %15 = vsyncpa [#allocation3], 0  ;;  %613 = vmatprep.subr.bf16.mxu1 %v612_v22  ;;  %v616_v32 = vpack.c.bf16 %v148_v26, %v147_v25  ;;  %v131_v33 = vld [vmem:[%s930_s4 + $0x40] sm:$0xff]  ;;  %v132_v34 = vld [vmem:[%s930_s4 + $0x48] sm:$0xff]  ;;  %599 = vmatpush3.bf16.msra.mxu0 %v598_v31  ;;  %vm46_vm1 = vcmask 130048   ;;  %vm241_vm2 = vcmask 261120  }
   0xf   :  { %v149_v35 = vld [vmem:[%s930_s4 + $0xd0] sm:$0xff]  ;;  %v150_v36 = vld [vmem:[%s930_s4 + $0xd8] sm:$0xff]  ;;  %v36_v37 = vld [vmem:[%s926_s0] sm:$0xff]  ;;  %632 = vmatprep.subr.bf16.mxu0 %v678_v7  ;;  %v618_v38 = vpack.c.bf16 %v132_v34, %v131_v33 }
  0x10   :  { %v620_v39 = vpack.c.bf16 %v150_v36, %v149_v35  ;;  %v133_v40 = vld [vmem:[%s930_s4 + $0x50] sm:$0xff]  ;;  %v134_v41 = vld [vmem:[%s930_s4 + $0x58] sm:$0xff]  ;;  %v151_v42 = vld [vmem:[%s930_s4 + $0xe0] sm:$0xff] }
  0x11   :  { %615 = vmatpush3.bf16.msra.mxu1 %v614_v30  ;;  %562 = vmatmul.mubr.msk.f32.vlgmr.msra.gmra.mrb[0].mxu0 %vm46_vm1, %v36_v37  ;;  %v152_v43 = vld [vmem:[%s930_s4 + $0xe8] sm:$0xff]  ;;  %v622_v44 = vpack.c.bf16 %v134_v41, %v133_v40  ;;  %v135_v46 = vld [vmem:[%s930_s4 + $0x60] sm:$0xff]  ;;  %v153_v48 = vld [vmem:[%s930_s4 + $0xf0] sm:$0xff] }
  0x12   :  { %617 = vmatprep.subr.bf16.mxu1 %v616_v32  ;;  %572 = vmatprep.mubr.msk.f32.mxu0 %vm679_vm0, %v680_v8  ;;  %v624_v45 = vpack.c.bf16 %v152_v43, %v151_v42  ;;  %v136_v47 = vld [vmem:[%s930_s4 + $0x68] sm:$0xff]  ;;  %v154_v49 = vld [vmem:[%s930_s4 + $0xf8] sm:$0xff]  ;;  %v137_v52 = vld [vmem:[%s930_s4 + $0x70] sm:$0xff] }
  0x13   :  { %v626_v50 = vpack.c.bf16 %v136_v47, %v135_v46  ;;  %v628_v51 = vpack.c.bf16 %v154_v49, %v153_v48  ;;  %v138_v53 = vld [vmem:[%s930_s4 + $0x78] sm:$0xff]  ;;  %v121_v55 = vld [vmem:[%s927_s1] sm:$0xff]  ;;  %v238_v57 = vld [vmem:[%s932_s6 + $0x28] sm:$0xff] }
  0x14   :  { %v630_v54 = vpack.c.bf16 %v138_v53, %v137_v52  ;;  %v237_v56 = vld [vmem:[%s932_s6 + $0x20] sm:$0xff]  ;;  %v239_v59 = vld [vmem:[%s932_s6 + $0x30] sm:$0xff]  ;;  %v240_v60 = vld [vmem:[%s932_s6 + $0x38] sm:$0xff] }
  0x15   :  { %619 = vmatpush3.bf16.msra.mxu1 %v618_v38  ;;  %v633_v58 = vpack.c.bf16 %v238_v57, %v237_v56  ;;  %v636_v61 = vpack.c.bf16 %v240_v60, %v239_v59  ;;  %v498_v1 = vld [vmem:[%s931_s5] ss:$0 sm:$0xff]  ;;  %v234_v5 = vld [vmem:[%s932_s6 + $0x8] sm:$0xff]  ;;  %v235_v12 = vld [vmem:[%s932_s6 + $0x10] sm:$0xff] }
  0x16   :  { %621 = vmatprep.subr.bf16.mxu1 %v620_v39  ;;  %v233_v4 = vld [vmem:[%s932_s6] sm:$0xff]  ;;  %v236_v13 = vld [vmem:[%s932_s6 + $0x18] sm:$0xff]  ;;  %v398_v18 = vld [vmem:[%s934_s8 + $0x8] sm:$0xff] }
  0x17   :  { %634 = vmatpush3.bf16.msra.mxu0 %v633_v58  ;;  %v639_v9 = vpack.c.bf16 %v234_v5, %v233_v4  ;;  %v496_v10 = vld [vmem:[%s929_s3] ss:$0 sm:$0xff]  ;;  %v642_v15 = vpack.c.bf16 %v236_v13, %v235_v12  ;;  %v399_v20 = vld [vmem:[%s934_s8 + $0x10] sm:$0xff] }
  0x18   :  { %635 = vmatprep.subr.bf16.mxu0 %v678_v7  ;;  %v397_v17 = vld [vmem:[%s934_s8] sm:$0xff] }
  0x19   :  { %623 = vmatpush3.bf16.msra.mxu1 %v622_v44  ;;  %v645_v19 = vpack.c.bf16 %v398_v18, %v397_v17  ;;  %v501_v25 = vld [vmem:[%s933_s7] ss:$0 sm:$0xff] }
  0x1a   :  { %625 = vmatprep.subr.bf16.mxu1 %v624_v45  ;;  %v502_v29 = vld [vmem:[%s935_s9] ss:$0 sm:$0xff] }
  0x1b   :  { %637 = vmatpush3.bf16.msra.mxu0 %v636_v61 }
  0x1c   :  { %638 = vmatprep.subr.bf16.mxu0 %v678_v7 }
  0x1d   :  { %627 = vmatpush3.bf16.msra.mxu1 %v626_v50 }
  0x1e   :  { %629 = vmatprep.subr.bf16.mxu1 %v628_v51 }
  0x21   :  { %631 = vmatpush3.bf16.msra.mxu1 %v630_v54 }
  0x24   :  { %227 = vmatmul.mubr.f32.vlgmr.msra.gmra.mrb[0].mxu1 %v121_v55 }
  0xe4   :  { %v116_v62 = vpop.f32.mrb[0].mxu0 }
  0xe5   :  { %v563_v63 = vpop.f32.mrb[1].mxu0  ;;  %v117_v14 = vadd.f32 %v496_v10, %v116_v62 }
  0xe7   :  { %v120_v16 = vmax.f32 %v117_v14, 0.0 }
  0xf7   :  { %v539_v0 = vpop.f32.mrb[0].mxu1 }
  0xf8   :  { %v540_v2 = vpop.f32.mrb[1].mxu1 }
  0xf9   :  { %v541_v3 = vadd.f32 %v540_v2, %v539_v0 }
  0xfb   :  { %v229_v6 = vadd.f32 %v541_v3, %v498_v1 }
  0xfd   :  { %v232_v11 = vmax.f32 %v229_v6, 0.0 }
  0xff   :  { %573 = vmatmul.mubr.msk.f32.vlgmr.msra.gmra.mrb[2].mxu0 %vm241_vm2, %v232_v11 }
 0x100   :  { %640 = vmatpush3.bf16.msra.mxu0 %v639_v9  ;;  %583 = vmatprep.mubr.msk.f32.mxu0 %vm679_vm0, %v680_v8 }
 0x101   :  { %641 = vmatprep.subr.bf16.mxu0 %v678_v7 }
 0x104   :  { %643 = vmatpush3.bf16.msra.mxu0 %v642_v15 }
 0x105   :  { %644 = vmatprep.subr.bf16.mxu0 %v678_v7 }
 0x107   :  { %584 = vmatmul.mubr.msk.f32.vlgmr.msra.gmra.mrb[4].mxu0 %vm241_vm2, %v120_v16 }
 0x108   :  { %594 = vmatprep.mubr.msk.f32.mxu0 %vm679_vm0, %v680_v8  ;;  %646 = vmatpush3.bf16.msra.mxu0 %v645_v19  ;;  %v400_v8 = vld [vmem:[%s934_s8 + $0x18] sm:$0xff]  ;;  %s681_s8 = smov [#allocation2]  }
 0x109   :  { %647 = vmatprep.subr.bf16.mxu0 %v678_v7  ;;  %v648_v21 = vpack.c.bf16 %v400_v8, %v399_v20  ;;  %s488_s28 = sshll.u32 %s681_s8, 4  ;;  %s489_s28 = int_to_ptr.vmem [resolvable:$true] %s488_s28 }
 0x10a   :  { %s654_s29 = scalar_lea.vmem %s489_s28, 128  ;;  %p659_p1 = scmp.lt.s32.totalorder %s489_s28, %s489_s28 }
 0x10b   :  { %p655_p0 = scmp.ne.s32.totalorder %s489_s28, %s654_s29  ;;  %p660_p2 = scmp.lt.s32.totalorder %s654_s29, %s654_s29 }
 0x10c   :  { %649 = vmatpush3.bf16.msra.mxu0 %v648_v21 }
 0x10d   :  { %p661_p3 = por %p660_p2, %p659_p1 }
 0x10f   :  { %p662_p4 = pnand %p661_p3, %p655_p0 }
 0x1d2   :  { %v311_v22 = vpop.f32.mrb[2].mxu0 }
 0x1d3   :  { %v574_v23 = vpop.f32.mrb[3].mxu0 }
 0x1da   :  { %v384_v24 = vpop.f32.mrb[4].mxu0 }
 0x1db   :  { %v385_v26 = vadd.f32 %v384_v24, %v311_v22  ;;  %v585_v27 = vpop.f32.mrb[5].mxu0 }
 0x1dd   :  { %v395_v7 = vadd.f32 %v501_v25, %v385_v26 }
 0x1df   :  { %v396_v28 = vmax.f32 %v395_v7, 0.0 }
 0x1e1   :  { %595 = vmatmul.mubr.msk.f32.vlgmr.msra.gmra.mrb[6].mxu0 %vm241_vm2, %v396_v28 }
 0x2b4   :  { %v477_v30 = vpop.f32.mrb[6].mxu0 }
 0x2b5   :  { %v478_v31 = vadd.f32 %v502_v29, %v477_v30  ;;  %v596_v32 = vpop.f32.mrb[7].mxu0 }
 0x2b7   :  { %481 = vst [vmem:[#allocation2] sm:$0xff] %v478_v31 }
 0x2b8   :  { %665 = shalt.err (!%p662_p4)
}
 0x2b9   :  { %s666_s1 = scalar_lea.hbm %s936_s10, 128 }
 0x2ba   :  { %p667_p5 = scmp.ne.s32.totalorder %s936_s10, %s666_s1  ;;  %p670_p6 = scmp.lt.u32.totalorder %s666_s1, %s936_s10 }
 0x2bc   :  { %p672_p7 = pnand %p670_p6, %p667_p5 }
 0x2be   :  { %675 = shalt.err (!%p672_p7)
}
 0x2bf   :  { %491 = dma.vmem_to_hbm [thread:$0]  %s489_s28, 128, %s936_s10, [#allocation3]  }
 0x2c0   :  { %676 = dma.done.wait [#allocation3], 128  }
 0x2c1   :  { %677 = vsyncadd [#allocation3], 4294967168 }
 0x2c2   :  { %495 = vsyncpa [#allocation3], 1 }

</bundles_post_ra>
